<compile_context>
chip_gen: v5e
topology: v5e:2x2
jax: 0.10.0
libtpu: 0.0.40
codegen_flags: <defaults>
</compile_context>

<pallas_src>
import functools

import jax
import jax.numpy as jnp
from jax.experimental import pallas as pl
from jax.experimental.pallas import tpu as pltpu

LANE = 128
MAX_BLOCK_ROWS = 1024  # ~1 MiB of f32 input bytes per grid step (2 streams)


def _num_splits():
    # 2 TensorCores per chip only on v7x; v5e/v6e are single-TC, so a size-2
    # "parallel" axis there would just duplicate init/writeback work.
    try:
        kind = jax.devices()[0].device_kind.lower()
    except Exception:
        return 1
    return 2 if "v7" in kind else 1


def _focal_dice_kernel(x_ref, t_ref, o_ref, *, n, block_rows, tiles_per_split,
                       gamma, alpha, eps, binary_targets):
    i = pl.program_id(0)   # split index ("parallel")
    j = pl.program_id(1)   # reduction step within split ("arbitrary")

    @pl.when(j == 0)
    def _():
        o_ref[...] = jnp.zeros_like(o_ref)

    x = x_ref[...].astype(jnp.float32)
    t = t_ref[...].astype(jnp.float32)

    def accumulate(xv, tv, fmask):
        # ---- dice partials: row-reduce to one (8, LANE) vreg each (VPU) ----
        o_ref[0, :, :] += (xv * tv).reshape(-1, 8, LANE).sum(axis=0)
        o_ref[1, :, :] += (xv + tv).reshape(-1, 8, LANE).sum(axis=0)

        # ---- focal partial --------------------------------------------------
        xc = jnp.clip(xv, eps, 1.0 - eps)
        if binary_targets:
            # Identical to the general formula for t in {0, 1}; fewer EUP ops.
            pos = tv > 0.5
            pt = jnp.where(pos, xc, 1.0 - xc)
            logpt = jnp.log(pt)
            at = jnp.where(pos, alpha, 1.0 - alpha)
        else:
            logpt = tv * jnp.log(xc) + (1.0 - tv) * jnp.log(1.0 - xc)
            pt = jnp.exp(logpt)
            at = alpha * tv + (1.0 - alpha) * (1.0 - tv)
        bce = -at * logpt
        if gamma == 0.0:
            focal = bce
        elif gamma == 1.0:
            focal = bce * (1.0 - pt)
        elif gamma == 2.0:
            om = 1.0 - pt
            focal = bce * om * om
        else:
            focal = bce * (1.0 - pt) ** gamma
        if fmask is not None:
            focal = jnp.where(fmask, focal, 0.0)
        o_ref[2, :, :] += focal.reshape(-1, 8, LANE).sum(axis=0)

    block_elems = block_rows * LANE
    # Valid elements remaining from this tile's (unclamped) start offset.
    rem = n - (i * tiles_per_split + j) * block_elems

    # Fast path: fully valid interior tile — no iota, no selects.
    @pl.when(rem >= block_elems)
    def _():
        accumulate(x, t, None)

    # Slow path: boundary tile / clamped duplicate step — mask before any use.
    @pl.when(rem < block_elems)
    def _():
        r = jax.lax.broadcasted_iota(jnp.int32, (block_rows, LANE), 0)
        c = jax.lax.broadcasted_iota(jnp.int32, (block_rows, LANE), 1)
        mask = r * LANE + c < rem
        accumulate(jnp.where(mask, x, 0.0), jnp.where(mask, t, 0.0), mask)


def focal_dice_loss(x, target, *, beta=1.0, gamma=0.01, alpha=0.25, eps=1e-7,
                    binary_targets=False):
    """Pallas implementation of FocalDiceLoss.forward (returns a scalar)."""
    n = int(x.size)
    xf = x.reshape(-1)          # native dtype; row-major == torch .view(-1)
    tf = target.reshape(-1)

    num_splits = _num_splits()

    # Pad (zeros) only to lane granularity (and to >= 8 rows for degenerate
    # tiny inputs); ragged sublane tails are handled by the in-kernel mask
    # plus a partial last input block.
    padded = max(((n + LANE - 1) // LANE) * LANE, 8 * LANE)
    if padded != n:
        xf = jnp.pad(xf, (0, padded - n))
        tf = jnp.pad(tf, (0, padded - n))
    rows = padded // LANE
    xp = xf.reshape(rows, LANE)
    tp = tf.reshape(rows, LANE)

    # Largest sublane-aligned tile <= cap that never exceeds the array rows.
    block_rows = min(MAX_BLOCK_ROWS, max(8, (rows // num_splits // 8) * 8))
    total_blocks = pl.cdiv(rows, block_rows)
    tiles_per_split = pl.cdiv(total_blocks, num_splits)

    def in_map(i, j):
        # Excess steps of the last split re-read the last valid block; the
        # in-kernel mask (computed from the unclamped index) zeroes them out.
        return (jnp.minimum(i * tiles_per_split + j, total_blocks - 1), 0)

    in_spec = pl.BlockSpec((block_rows, LANE), in_map)
    out_spec = pl.BlockSpec((None, 3, 8, LANE), lambda i, j: (i, 0, 0, 0))
    out_sds = jax.ShapeDtypeStruct((num_splits, 3, 8, LANE), jnp.float32)

    kernel = functools.partial(
        _focal_dice_kernel, n=n, block_rows=block_rows,
        tiles_per_split=tiles_per_split, gamma=float(gamma),
        alpha=float(alpha), eps=float(eps),
        binary_targets=bool(binary_targets))

    in_bytes = int(xp.size * xp.dtype.itemsize + tp.size * tp.dtype.itemsize)
    out_bytes = int(num_splits * 3 * 8 * LANE * 4)
    n_trans = (4 if binary_targets else 6) * n

    partials = pl.pallas_call(
        kernel,
        out_shape=out_sds,
        grid_spec=pltpu.PrefetchScalarGridSpec(
            num_scalar_prefetch=0,
            grid=(num_splits, tiles_per_split),
            in_specs=[in_spec, in_spec],
            out_specs=out_spec,
        ),
        compiler_params=pltpu.CompilerParams(
            dimension_semantics=("parallel", "arbitrary"),
            vmem_limit_bytes=32 * 1024 * 1024),
        cost_estimate=pl.CostEstimate(
            flops=20 * n, transcendentals=n_trans,
            bytes_accessed=in_bytes + out_bytes),
    )(xp, tp)

    # Tiny epilogue: one reduction over (num_splits, 3, 8, 128) partials.
    sums = jnp.sum(partials, axis=(0, 2, 3))   # (3,)
    intersection, denom, fc_loss = sums[0], sums[1], sums[2]

    smooth = 1.0
    dc_loss = (2.0 * intersection + smooth) / (denom + smooth)
    loss = (jnp.log(jnp.maximum(fc_loss, 1e-7))
            - beta * jnp.log(jnp.maximum(dc_loss, 1e-7)))
    return loss


def _reference(x, t, beta=1.0, gamma=0.01, alpha=0.25, eps=1e-7):
    xf = x.reshape(-1).astype(jnp.float32)
    tf = t.reshape(-1).astype(jnp.float32)
    smooth = 1.0
    dc = (2.0 * jnp.sum(xf * tf) + smooth) / (jnp.sum(xf) + jnp.sum(tf) + smooth)
    xc = jnp.clip(xf, eps, 1.0 - eps)
    logpt = tf * jnp.log(xc) + (1.0 - tf) * jnp.log(1.0 - xc)
    pt = jnp.exp(logpt)
    at = alpha * tf + (1.0 - alpha) * (1.0 - tf)
    fc = jnp.sum(-at * logpt * (1.0 - pt) ** gamma)
    return (jnp.log(jnp.maximum(fc, 1e-7))
            - beta * jnp.log(jnp.maximum(dc, 1e-7)))


if __name__ == "__main__":
    key = jax.random.PRNGKey(0)
    k1, k2 = jax.random.split(key)
    # predicted probabilities in (0, 1), binary targets — NCHW like the torch module
    x = jax.nn.sigmoid(jax.random.normal(k1, (2, 4, 16, 16), dtype=jnp.float32))
    target = (jax.random.uniform(k2, (2, 4, 16, 16)) > 0.5).astype(jnp.float32)

    loss = focal_dice_loss(x, target)
    loss = jax.block_until_ready(loss)

    ref = _reference(x, target)
    assert jnp.allclose(loss, ref, rtol=1e-4, atol=1e-5), (loss, ref)
    print("KERNEL_OK")
</pallas_src>

<mosaic_0001>
module attributes {stable_mosaic.version = 11 : i64} {
  func.func @_focal_dice_kernel(%arg0: i32, %arg1: i32, %arg2: memref<16x128xf32, #tpu.memory_space<vmem>>, %arg3: memref<16x128xf32, #tpu.memory_space<vmem>>, %arg4: memref<1x3x8x128xf32, #tpu.memory_space<vmem>>) attributes {dimension_semantics = [#tpu.dimension_semantics<parallel>, #tpu.dimension_semantics<arbitrary>], iteration_bounds = array<i64: 1, 1>, scalar_prefetch = 0 : i64, scratch_operands = 0 : i64, tpu.core_type = #tpu.core_type<tc>, window_params = [{transform_indices = @transform_0, window_bounds = array<i64: 16, 128>}, {transform_indices = @transform_1, window_bounds = array<i64: 16, 128>}, {transform_indices = @transform_2, window_bounds = array<i64: 1, 3, 8, 128>}]} {
    %c0_i32 = arith.constant 0 : i32
    %0 = arith.cmpi eq, %arg1, %c0_i32 : i32
    %1 = arith.extui %0 : i1 to i32
    %c0_i32_0 = arith.constant 0 : i32
    %2 = arith.cmpi ne, %1, %c0_i32_0 : i32
    scf.if %2 {
      %cst = arith.constant 0.000000e+00 : f32
      %15 = vector.broadcast %cst : f32 to vector<3x8x128xf32>
      %c0_9 = arith.constant 0 : index
      %c0_10 = arith.constant 0 : index
      %c0_11 = arith.constant 0 : index
      %c0_12 = arith.constant 0 : index
      %16 = vector.load %arg4[%c0_9, %c0_10, %c0_11, %c0_12] : memref<1x3x8x128xf32, #tpu.memory_space<vmem>>, vector<1x3x8x128xf32>
      %17 = vector.shape_cast %16 : vector<1x3x8x128xf32> to vector<3x8x128xf32>
      %18 = vector.shape_cast %15 : vector<3x8x128xf32> to vector<1x3x8x128xf32>
      tpu.vector_store %arg4[%c0_9, %c0_10, %c0_11, %c0_12], %18 {strides = array<i32>} : memref<1x3x8x128xf32, #tpu.memory_space<vmem>>, vector<1x3x8x128xf32>,
    } else {
    }
    %c0 = arith.constant 0 : index
    %c0_1 = arith.constant 0 : index
    %3 = vector.load %arg2[%c0, %c0_1] : memref<16x128xf32, #tpu.memory_space<vmem>>, vector<16x128xf32>
    %c0_2 = arith.constant 0 : index
    %c0_3 = arith.constant 0 : index
    %4 = vector.load %arg3[%c0_2, %c0_3] : memref<16x128xf32, #tpu.memory_space<vmem>>, vector<16x128xf32>
    %c1_i32 = arith.constant 1 : i32
    %5 = arith.muli %arg0, %c1_i32 : i32
    %6 = arith.addi %5, %arg1 : i32
    %c2048_i32 = arith.constant 2048 : i32
    %7 = arith.muli %6, %c2048_i32 : i32
    %c2048_i32_4 = arith.constant 2048 : i32
    %8 = arith.subi %c2048_i32_4, %7 : i32
    %c2048_i32_5 = arith.constant 2048 : i32
    %9 = arith.cmpi sge, %8, %c2048_i32_5 : i32
    %10 = arith.extui %9 : i1 to i32
    %c0_i32_6 = arith.constant 0 : i32
    %11 = arith.cmpi ne, %10, %c0_i32_6 : i32
    scf.if %11 {
      %c0_9 = arith.constant 0 : index
      %c0_10 = arith.constant 0 : index
      %c0_11 = arith.constant 0 : index
      %c0_12 = arith.constant 0 : index
      %15 = vector.load %arg4[%c0_9, %c0_10, %c0_11, %c0_12] : memref<1x3x8x128xf32, #tpu.memory_space<vmem>>, vector<1x1x8x128xf32>
      %16 = vector.shape_cast %15 : vector<1x1x8x128xf32> to vector<8x128xf32>
      %17 = arith.mulf %3, %4 : vector<16x128xf32>
      %18 = vector.shape_cast %17 : vector<16x128xf32> to vector<2x8x128xf32>
      %cst = arith.constant dense<0.000000e+00> : vector<8x128xf32>
      %19 = vector.multi_reduction <add>, %18, %cst [0] : vector<2x8x128xf32> to vector<8x128xf32>
      %20 = arith.addf %16, %19 : vector<8x128xf32>
      %c0_13 = arith.constant 0 : index
      %c0_14 = arith.constant 0 : index
      %c0_15 = arith.constant 0 : index
      %c0_16 = arith.constant 0 : index
      %21 = vector.load %arg4[%c0_13, %c0_14, %c0_15, %c0_16] : memref<1x3x8x128xf32, #tpu.memory_space<vmem>>, vector<1x1x8x128xf32>
      %22 = vector.shape_cast %21 : vector<1x1x8x128xf32> to vector<8x128xf32>
      %23 = vector.shape_cast %20 : vector<8x128xf32> to vector<1x1x8x128xf32>
      tpu.vector_store %arg4[%c0_13, %c0_14, %c0_15, %c0_16], %23 {strides = array<i32>} : memref<1x3x8x128xf32, #tpu.memory_space<vmem>>, vector<1x1x8x128xf32>,
      %c0_17 = arith.constant 0 : index
      %c1 = arith.constant 1 : index
      %c0_18 = arith.constant 0 : index
      %c0_19 = arith.constant 0 : index
      %24 = vector.load %arg4[%c0_17, %c1, %c0_18, %c0_19] : memref<1x3x8x128xf32, #tpu.memory_space<vmem>>, vector<1x1x8x128xf32>
      %25 = vector.shape_cast %24 : vector<1x1x8x128xf32> to vector<8x128xf32>
      %26 = arith.addf %3, %4 : vector<16x128xf32>
      %27 = vector.shape_cast %26 : vector<16x128xf32> to vector<2x8x128xf32>
      %cst_20 = arith.constant dense<0.000000e+00> : vector<8x128xf32>
      %28 = vector.multi_reduction <add>, %27, %cst_20 [0] : vector<2x8x128xf32> to vector<8x128xf32>
      %29 = arith.addf %25, %28 : vector<8x128xf32>
      %c0_21 = arith.constant 0 : index
      %c1_22 = arith.constant 1 : index
      %c0_23 = arith.constant 0 : index
      %c0_24 = arith.constant 0 : index
      %30 = vector.load %arg4[%c0_21, %c1_22, %c0_23, %c0_24] : memref<1x3x8x128xf32, #tpu.memory_space<vmem>>, vector<1x1x8x128xf32>
      %31 = vector.shape_cast %30 : vector<1x1x8x128xf32> to vector<8x128xf32>
      %32 = vector.shape_cast %29 : vector<8x128xf32> to vector<1x1x8x128xf32>
      tpu.vector_store %arg4[%c0_21, %c1_22, %c0_23, %c0_24], %32 {strides = array<i32>} : memref<1x3x8x128xf32, #tpu.memory_space<vmem>>, vector<1x1x8x128xf32>,
      %cst_25 = arith.constant 1.000000e-07 : f32
      %cst_26 = arith.constant 0.99999988 : f32
      %33 = vector.broadcast %cst_25 : f32 to vector<16x128xf32>
      %34 = arith.maximumf %33, %3 : vector<16x128xf32>
      %35 = vector.broadcast %cst_26 : f32 to vector<16x128xf32>
      %36 = arith.minimumf %35, %34 : vector<16x128xf32>
      %37 = math.log %36 : vector<16x128xf32>
      %38 = arith.mulf %4, %37 : vector<16x128xf32>
      %cst_27 = arith.constant 1.000000e+00 : f32
      %39 = vector.broadcast %cst_27 : f32 to vector<16x128xf32>
      %40 = arith.subf %39, %4 : vector<16x128xf32>
      %cst_28 = arith.constant 1.000000e+00 : f32
      %41 = vector.broadcast %cst_28 : f32 to vector<16x128xf32>
      %42 = arith.subf %41, %36 : vector<16x128xf32>
      %43 = math.log %42 : vector<16x128xf32>
      %44 = arith.mulf %40, %43 : vector<16x128xf32>
      %45 = arith.addf %38, %44 : vector<16x128xf32>
      %46 = math.exp %45 : vector<16x128xf32>
      %cst_29 = arith.constant 2.500000e-01 : f32
      %47 = vector.broadcast %cst_29 : f32 to vector<16x128xf32>
      %48 = arith.mulf %47, %4 : vector<16x128xf32>
      %cst_30 = arith.constant 1.000000e+00 : f32
      %49 = vector.broadcast %cst_30 : f32 to vector<16x128xf32>
      %50 = arith.subf %49, %4 : vector<16x128xf32>
      %cst_31 = arith.constant 7.500000e-01 : f32
      %51 = vector.broadcast %cst_31 : f32 to vector<16x128xf32>
      %52 = arith.mulf %51, %50 : vector<16x128xf32>
      %53 = arith.addf %48, %52 : vector<16x128xf32>
      %cst_32 = arith.constant 0.000000e+00 : f32
      %54 = vector.broadcast %cst_32 : f32 to vector<16x128xf32>
      %55 = arith.subf %54, %53 : vector<16x128xf32>
      %56 = arith.mulf %55, %45 : vector<16x128xf32>
      %cst_33 = arith.constant 1.000000e+00 : f32
      %57 = vector.broadcast %cst_33 : f32 to vector<16x128xf32>
      %58 = arith.subf %57, %46 : vector<16x128xf32>
      %cst_34 = arith.constant 0.00999999977 : f32
      %59 = vector.broadcast %cst_34 : f32 to vector<16x128xf32>
      %60 = math.powf %58, %59 : vector<16x128xf32>
      %61 = arith.mulf %56, %60 : vector<16x128xf32>
      %c0_35 = arith.constant 0 : index
      %c2 = arith.constant 2 : index
      %c0_36 = arith.constant 0 : index
      %c0_37 = arith.constant 0 : index
      %62 = vector.load %arg4[%c0_35, %c2, %c0_36, %c0_37] : memref<1x3x8x128xf32, #tpu.memory_space<vmem>>, vector<1x1x8x128xf32>
      %63 = vector.shape_cast %62 : vector<1x1x8x128xf32> to vector<8x128xf32>
      %64 = vector.shape_cast %61 : vector<16x128xf32> to vector<2x8x128xf32>
      %cst_38 = arith.constant dense<0.000000e+00> : vector<8x128xf32>
      %65 = vector.multi_reduction <add>, %64, %cst_38 [0] : vector<2x8x128xf32> to vector<8x128xf32>
      %66 = arith.addf %63, %65 : vector<8x128xf32>
      %c0_39 = arith.constant 0 : index
      %c2_40 = arith.constant 2 : index
      %c0_41 = arith.constant 0 : index
      %c0_42 = arith.constant 0 : index
      %67 = vector.load %arg4[%c0_39, %c2_40, %c0_41, %c0_42] : memref<1x3x8x128xf32, #tpu.memory_space<vmem>>, vector<1x1x8x128xf32>
      %68 = vector.shape_cast %67 : vector<1x1x8x128xf32> to vector<8x128xf32>
      %69 = vector.shape_cast %66 : vector<8x128xf32> to vector<1x1x8x128xf32>
      tpu.vector_store %arg4[%c0_39, %c2_40, %c0_41, %c0_42], %69 {strides = array<i32>} : memref<1x3x8x128xf32, #tpu.memory_space<vmem>>, vector<1x1x8x128xf32>,
    } else {
    }
    %c2048_i32_7 = arith.constant 2048 : i32
    %12 = arith.cmpi slt, %8, %c2048_i32_7 : i32
    %13 = arith.extui %12 : i1 to i32
    %c0_i32_8 = arith.constant 0 : i32
    %14 = arith.cmpi ne, %13, %c0_i32_8 : i32
    scf.if %14 {
      %15 = tpu.iota {dimensions = array<i32: 0>} : vector<16x128xi32>
      %16 = tpu.iota {dimensions = array<i32: 1>} : vector<16x128xi32>
      %c128_i32 = arith.constant 128 : i32
      %17 = vector.broadcast %c128_i32 : i32 to vector<16x128xi32>
      %18 = arith.muli %15, %17 : vector<16x128xi32>
      %19 = arith.addi %18, %16 : vector<16x128xi32>
      %20 = vector.broadcast %8 : i32 to vector<16x128xi32>
      %21 = arith.cmpi slt, %19, %20 : vector<16x128xi32>
      %cst = arith.constant 0.000000e+00 : f32
      %22 = vector.broadcast %cst : f32 to vector<16x128xf32>
      %23 = arith.select %21, %3, %22 : vector<16x128xi1>, vector<16x128xf32>
      %cst_9 = arith.constant 0.000000e+00 : f32
      %24 = vector.broadcast %cst_9 : f32 to vector<16x128xf32>
      %25 = arith.select %21, %4, %24 : vector<16x128xi1>, vector<16x128xf32>
      %c0_10 = arith.constant 0 : index
      %c0_11 = arith.constant 0 : index
      %c0_12 = arith.constant 0 : index
      %c0_13 = arith.constant 0 : index
      %26 = vector.load %arg4[%c0_10, %c0_11, %c0_12, %c0_13] : memref<1x3x8x128xf32, #tpu.memory_space<vmem>>, vector<1x1x8x128xf32>
      %27 = vector.shape_cast %26 : vector<1x1x8x128xf32> to vector<8x128xf32>
      %28 = arith.mulf %23, %25 : vector<16x128xf32>
      %29 = vector.shape_cast %28 : vector<16x128xf32> to vector<2x8x128xf32>
      %cst_14 = arith.constant dense<0.000000e+00> : vector<8x128xf32>
      %30 = vector.multi_reduction <add>, %29, %cst_14 [0] : vector<2x8x128xf32> to vector<8x128xf32>
      %31 = arith.addf %27, %30 : vector<8x128xf32>
      %c0_15 = arith.constant 0 : index
      %c0_16 = arith.constant 0 : index
      %c0_17 = arith.constant 0 : index
      %c0_18 = arith.constant 0 : index
      %32 = vector.load %arg4[%c0_15, %c0_16, %c0_17, %c0_18] : memref<1x3x8x128xf32, #tpu.memory_space<vmem>>, vector<1x1x8x128xf32>
      %33 = vector.shape_cast %32 : vector<1x1x8x128xf32> to vector<8x128xf32>
      %34 = vector.shape_cast %31 : vector<8x128xf32> to vector<1x1x8x128xf32>
      tpu.vector_store %arg4[%c0_15, %c0_16, %c0_17, %c0_18], %34 {strides = array<i32>} : memref<1x3x8x128xf32, #tpu.memory_space<vmem>>, vector<1x1x8x128xf32>,
      %c0_19 = arith.constant 0 : index
      %c1 = arith.constant 1 : index
      %c0_20 = arith.constant 0 : index
      %c0_21 = arith.constant 0 : index
      %35 = vector.load %arg4[%c0_19, %c1, %c0_20, %c0_21] : memref<1x3x8x128xf32, #tpu.memory_space<vmem>>, vector<1x1x8x128xf32>
      %36 = vector.shape_cast %35 : vector<1x1x8x128xf32> to vector<8x128xf32>
      %37 = arith.addf %23, %25 : vector<16x128xf32>
      %38 = vector.shape_cast %37 : vector<16x128xf32> to vector<2x8x128xf32>
      %cst_22 = arith.constant dense<0.000000e+00> : vector<8x128xf32>
      %39 = vector.multi_reduction <add>, %38, %cst_22 [0] : vector<2x8x128xf32> to vector<8x128xf32>
      %40 = arith.addf %36, %39 : vector<8x128xf32>
      %c0_23 = arith.constant 0 : index
      %c1_24 = arith.constant 1 : index
      %c0_25 = arith.constant 0 : index
      %c0_26 = arith.constant 0 : index
      %41 = vector.load %arg4[%c0_23, %c1_24, %c0_25, %c0_26] : memref<1x3x8x128xf32, #tpu.memory_space<vmem>>, vector<1x1x8x128xf32>
      %42 = vector.shape_cast %41 : vector<1x1x8x128xf32> to vector<8x128xf32>
      %43 = vector.shape_cast %40 : vector<8x128xf32> to vector<1x1x8x128xf32>
      tpu.vector_store %arg4[%c0_23, %c1_24, %c0_25, %c0_26], %43 {strides = array<i32>} : memref<1x3x8x128xf32, #tpu.memory_space<vmem>>, vector<1x1x8x128xf32>,
      %cst_27 = arith.constant 1.000000e-07 : f32
      %cst_28 = arith.constant 0.99999988 : f32
      %44 = vector.broadcast %cst_27 : f32 to vector<16x128xf32>
      %45 = arith.maximumf %44, %23 : vector<16x128xf32>
      %46 = vector.broadcast %cst_28 : f32 to vector<16x128xf32>
      %47 = arith.minimumf %46, %45 : vector<16x128xf32>
      %48 = math.log %47 : vector<16x128xf32>
      %49 = arith.mulf %25, %48 : vector<16x128xf32>
      %cst_29 = arith.constant 1.000000e+00 : f32
      %50 = vector.broadcast %cst_29 : f32 to vector<16x128xf32>
      %51 = arith.subf %50, %25 : vector<16x128xf32>
      %cst_30 = arith.constant 1.000000e+00 : f32
      %52 = vector.broadcast %cst_30 : f32 to vector<16x128xf32>
      %53 = arith.subf %52, %47 : vector<16x128xf32>
      %54 = math.log %53 : vector<16x128xf32>
      %55 = arith.mulf %51, %54 : vector<16x128xf32>
      %56 = arith.addf %49, %55 : vector<16x128xf32>
      %57 = math.exp %56 : vector<16x128xf32>
      %cst_31 = arith.constant 2.500000e-01 : f32
      %58 = vector.broadcast %cst_31 : f32 to vector<16x128xf32>
      %59 = arith.mulf %58, %25 : vector<16x128xf32>
      %cst_32 = arith.constant 1.000000e+00 : f32
      %60 = vector.broadcast %cst_32 : f32 to vector<16x128xf32>
      %61 = arith.subf %60, %25 : vector<16x128xf32>
      %cst_33 = arith.constant 7.500000e-01 : f32
      %62 = vector.broadcast %cst_33 : f32 to vector<16x128xf32>
      %63 = arith.mulf %62, %61 : vector<16x128xf32>
      %64 = arith.addf %59, %63 : vector<16x128xf32>
      %cst_34 = arith.constant 0.000000e+00 : f32
      %65 = vector.broadcast %cst_34 : f32 to vector<16x128xf32>
      %66 = arith.subf %65, %64 : vector<16x128xf32>
      %67 = arith.mulf %66, %56 : vector<16x128xf32>
      %cst_35 = arith.constant 1.000000e+00 : f32
      %68 = vector.broadcast %cst_35 : f32 to vector<16x128xf32>
      %69 = arith.subf %68, %57 : vector<16x128xf32>
      %cst_36 = arith.constant 0.00999999977 : f32
      %70 = vector.broadcast %cst_36 : f32 to vector<16x128xf32>
      %71 = math.powf %69, %70 : vector<16x128xf32>
      %72 = arith.mulf %67, %71 : vector<16x128xf32>
      %cst_37 = arith.constant 0.000000e+00 : f32
      %73 = vector.broadcast %cst_37 : f32 to vector<16x128xf32>
      %74 = arith.select %21, %72, %73 : vector<16x128xi1>, vector<16x128xf32>
      %c0_38 = arith.constant 0 : index
      %c2 = arith.constant 2 : index
      %c0_39 = arith.constant 0 : index
      %c0_40 = arith.constant 0 : index
      %75 = vector.load %arg4[%c0_38, %c2, %c0_39, %c0_40] : memref<1x3x8x128xf32, #tpu.memory_space<vmem>>, vector<1x1x8x128xf32>
      %76 = vector.shape_cast %75 : vector<1x1x8x128xf32> to vector<8x128xf32>
      %77 = vector.shape_cast %74 : vector<16x128xf32> to vector<2x8x128xf32>
      %cst_41 = arith.constant dense<0.000000e+00> : vector<8x128xf32>
      %78 = vector.multi_reduction <add>, %77, %cst_41 [0] : vector<2x8x128xf32> to vector<8x128xf32>
      %79 = arith.addf %76, %78 : vector<8x128xf32>
      %c0_42 = arith.constant 0 : index
      %c2_43 = arith.constant 2 : index
      %c0_44 = arith.constant 0 : index
      %c0_45 = arith.constant 0 : index
      %80 = vector.load %arg4[%c0_42, %c2_43, %c0_44, %c0_45] : memref<1x3x8x128xf32, #tpu.memory_space<vmem>>, vector<1x1x8x128xf32>
      %81 = vector.shape_cast %80 : vector<1x1x8x128xf32> to vector<8x128xf32>
      %82 = vector.shape_cast %79 : vector<8x128xf32> to vector<1x1x8x128xf32>
      tpu.vector_store %arg4[%c0_42, %c2_43, %c0_44, %c0_45], %82 {strides = array<i32>} : memref<1x3x8x128xf32, #tpu.memory_space<vmem>>, vector<1x1x8x128xf32>,
    } else {
    }
    return
  }
  func.func @transform_0(%arg0: i32, %arg1: i32) -> (i32, i32) {
    %c1_i32 = arith.constant 1 : i32
    %0 = arith.muli %arg0, %c1_i32 : i32
    %1 = arith.addi %0, %arg1 : i32
    %c0_i32 = arith.constant 0 : i32
    %2 = arith.minsi %1, %c0_i32 : i32
    %c0_i32_0 = arith.constant 0 : i32
    %c0_i32_1 = arith.constant 0 : i32
    return %2, %c0_i32_0 : i32, i32
  }
  func.func @transform_1(%arg0: i32, %arg1: i32) -> (i32, i32) {
    %c1_i32 = arith.constant 1 : i32
    %0 = arith.muli %arg0, %c1_i32 : i32
    %1 = arith.addi %0, %arg1 : i32
    %c0_i32 = arith.constant 0 : i32
    %2 = arith.minsi %1, %c0_i32 : i32
    %c0_i32_0 = arith.constant 0 : i32
    %c0_i32_1 = arith.constant 0 : i32
    return %2, %c0_i32_0 : i32, i32
  }
  func.func @transform_2(%arg0: i32, %arg1: i32) -> (i32, i32, i32, i32) {
    %c0_i32 = arith.constant 0 : i32
    %c0_i32_0 = arith.constant 0 : i32
    %c0_i32_1 = arith.constant 0 : i32
    %c0_i32_2 = arith.constant 0 : i32
    return %arg0, %c0_i32, %c0_i32_0, %c0_i32_1 : i32, i32, i32, i32
  }
}

</mosaic_0001>

<bundles_post_ra>
// kernel: tpu_custom_call.1
= control target key start
LH: loop header
LB: loop body
LE: loop exit
PB: predicated region body
PF: predicated region fallthrough
CT: control target
= control target key end

     0   :  { %7 = vsyncpa [#allocation3], 0  ;;  %s574_s0 = inlined_call_operand.hbm [shape: f32[16,128], index: 0, kind: input, shape index: {}]   ;;  %s575_s1 = inlined_call_operand.hbm [shape: f32[16,128], index: 1, kind: input, shape index: {}]   ;;  %s576_s2 = inlined_call_operand.hbm [shape: f32[1,3,8,128], index: 2, kind: output, shape index: {}]  }
   0x1   :  { %8 = vsyncpa [#allocation6], 0 }
   0x2   :  { %9 = vsyncpa [#allocation4], 0  ;;  %s20_s11 = sshll.u32 %s574_s0, 4  ;;  %s490_s12 = smov [#allocation2]   ;;  %s21_s11 = int_to_ptr.hbm [resolvable:$true] %s20_s11 }
   0x3   :  { %s22_s13 = sshll.u32 %s490_s12, 4  ;;  %s39_s16 = sshll.u32 %s575_s1, 4  ;;  %s23_s13 = int_to_ptr.vmem [resolvable:$true] %s22_s13  ;;  %s40_s16 = int_to_ptr.hbm [resolvable:$true] %s39_s16 }
   0x4   :  { %s491_s17 = smov 128   ;;  %s492_s18 = smov 8  }
   0x5   :  { %28 = dma.hbm_to_vmem [thread:$0]  %s21_s11, 256, %s23_s13, [#allocation3], %s491_s17, %s491_s17, %s492_s18  }
   0x6   :  { %s493_s19 = smov [#allocation5]  }
   0x7   :  { %s41_s20 = sshll.u32 %s493_s19, 4  ;;  %s42_s20 = int_to_ptr.vmem [resolvable:$true] %s41_s20 }
   0x8   :  { %47 = dma.hbm_to_vmem [thread:$0]  %s40_s16, 256, %s42_s20, [#allocation6], %s491_s17, %s491_s17, %s492_s18  }
   0x9   :  { %484 = dma.done.wait [#allocation3], 256  }
   0xa   :  { %485 = vsyncadd [#allocation3], 4294967040 }
   0xb   :  { %486 = dma.done.wait [#allocation6], 256  }
   0xc   :  { %487 = vsyncadd [#allocation6], 4294967040  ;;  %v71_v0 = vld [vmem:[#allocation2] sm:$0xff]  ;;  %v72_v1 = vld [vmem:[#allocation2 + $0x8] sm:$0xff]  ;;  %s494_s0 = smov [#allocation7]   ;;  %s230_s23 = sshll.u32 %s576_s2, 4  ;;  %s231_s23 = int_to_ptr.hbm [resolvable:$true] %s230_s23 }
   0xd   :  { %v73_v2 = vld [vmem:[#allocation5] sm:$0xff]  ;;  %v74_v3 = vld [vmem:[#allocation5 + $0x8] sm:$0xff]  ;;  %v95_v5 = vmax.f32 %v71_v0, 1e-07  ;;  %v96_v6 = vmax.f32 %v72_v1, 1e-07 }
   0xe   :  { %v83_v4 = vmul.f32 %v73_v2, %v71_v0  ;;  %v90_v7 = vadd.f32 %v73_v2, %v71_v0  ;;  %v84_v8 = vmul.f32 %v74_v3, %v72_v1  ;;  %v91_v9 = vadd.f32 %v74_v3, %v72_v1  ;;  %s228_s1 = sshll.u32 %s494_s0, 4  ;;  %s229_s1 = int_to_ptr.vmem [resolvable:$true] %s228_s1 }
   0xf   :  { %v105_v10 = vsub.f32 1.0, %v73_v2  ;;  %v106_v11 = vsub.f32 1.0, %v74_v3  ;;  %v97_v12 = vmin.f32 %v95_v5, 0.9999999  ;;  %v98_v13 = vmin.f32 %v96_v6, 0.9999999 }
  0x10   :  { %v121_v14 = vmul.f32 0.25, %v73_v2  ;;  %v122_v15 = vmul.f32 0.25, %v74_v3  ;;  %v85_v16 = vadd.f32 %v84_v8, %v83_v4  ;;  %v92_v17 = vadd.f32 %v91_v9, %v90_v7 }
  0x11   :  { %v123_v18 = vmul.f32 0.75, %v105_v10  ;;  %v124_v19 = vmul.f32 0.75, %v106_v11  ;;  %396 = vlog2.f32 %v97_v12  ;;  %v107_v20 = vsub.f32 1.0, %v97_v12 }
  0x12   :  { %v108_v21 = vsub.f32 1.0, %v98_v13  ;;  %398 = vlog2.f32 %v98_v13  ;;  %87 = vst [vmem:[#allocation7] sm:$0xff] %v85_v16 }
  0x13   :  { %v125_v22 = vadd.f32 %v123_v18, %v121_v14  ;;  %400 = vlog2.f32 %v107_v20  ;;  %v126_v23 = vadd.f32 %v124_v19, %v122_v15  ;;  %94 = vst [vmem:[#allocation7 + $0x8] sm:$0xff] %v92_v17 }
  0x14   :  { %402 = vlog2.f32 %v108_v21 }
  0x15   :  { %v127_v35 = vsub.f32 0.0, %v125_v22  ;;  %v128_v37 = vsub.f32 0.0, %v126_v23 }
  0x17   :  { %v397_v24 = vpop.eup %396 }
  0x18   :  { %v399_v25 = vpop.eup %398  ;;  %v100_v26 = vmul.f32 0.6931472, %v397_v24 }
  0x19   :  { %v401_v27 = vpop.eup %400  ;;  %v102_v28 = vmul.f32 0.6931472, %v399_v25 }
  0x1a   :  { %v403_v29 = vpop.eup %402  ;;  %v103_v30 = vmul.f32 %v100_v26, %v73_v2  ;;  %v110_v31 = vmul.f32 0.6931472, %v401_v27 }
  0x1b   :  { %v104_v32 = vmul.f32 %v102_v28, %v74_v3  ;;  %v112_v33 = vmul.f32 0.6931472, %v403_v29 }
  0x1c   :  { %v113_v34 = vmul.f32 %v110_v31, %v105_v10 }
  0x1d   :  { %v114_v36 = vmul.f32 %v112_v33, %v106_v11 }
  0x1e   :  { %v115_v38 = vadd.f32 %v113_v34, %v103_v30 }
  0x1f   :  { %v116_v39 = vadd.f32 %v114_v36, %v104_v32 }
  0x20   :  { %v117_v40 = vmul.f32 1.442695, %v115_v38  ;;  %v522_v41 = vmul.f32 %v127_v35, %v115_v38 }
  0x21   :  { %v119_v42 = vmul.f32 1.442695, %v116_v39  ;;  %v524_v43 = vmul.f32 %v128_v37, %v116_v39 }
  0x22   :  { %404 = vpow2.f32 %v117_v40 }
  0x23   :  { %406 = vpow2.f32 %v119_v42 }
  0x28   :  { %v405_v44 = vpop.eup %404 }
  0x29   :  { %v407_v45 = vpop.eup %406  ;;  %v526_v46 = vsub.f32 1.0, %v405_v44 }
  0x2a   :  { %v528_v47 = vsub.f32 1.0, %v407_v45 }
  0x2b   :  { %v531_v48 = vand.u32 2147483647, %v526_v46  ;;  %vm299_vm10 = vcmp.lt.f32.partialorder %v526_v46, 0  ;;  %vm300_vm11 = vcmp.eq.f32.partialorder %v526_v46, 0  ;;  %vm312_vm14 = vcmp.ne.f32.partialorder %v526_v46, %v526_v46 }
  0x2c   :  { %v534_v49 = vand.u32 2147483647, %v528_v47  ;;  %vm370_vm13 = vcmp.lt.f32.partialorder %v528_v47, 0  ;;  %vm371_vm15 = vcmp.eq.f32.partialorder %v528_v47, 0 }
  0x2d   :  { %v258_v50 = vand.u32 8388607, %v531_v48  ;;  %v254_v62 = vand.u32 2139095040, %v531_v48  ;;  %vm292_vm2 = vweird.f32 %v531_v48  ;;  %vm291_vm3 = vcmp.lt.f32.partialorder %v531_v48, 0.0 }
  0x2e   :  { %v329_v51 = vand.u32 8388607, %v534_v49  ;;  %v325_v2 = vand.u32 2139095040, %v534_v49  ;;  %vm290_vm4 = vcmp.eq.f32.partialorder %v531_v48, 0.0  ;;  %vm363_vm5 = vweird.f32 %v534_v49 }
  0x2f   :  { %v259_v52 = vor.u32 8388608, %v258_v50  ;;  %v255_v6 = vshrl.u32 %v254_v62, 23  ;;  %vm289_vm6 = vcmp.eq.f32.partialorder %v531_v48, 1.0  ;;  %vm362_vm7 = vcmp.lt.f32.partialorder %v534_v49, 0.0 }
  0x30   :  { %v330_v54 = vor.u32 8388608, %v329_v51  ;;  %v326_v10 = vshrl.u32 %v325_v2, 23  ;;  %vm361_vm8 = vcmp.eq.f32.partialorder %v534_v49, 0.0  ;;  %vm360_vm9 = vcmp.eq.f32.partialorder %v534_v49, 1.0 }
  0x31   :  { %v261_v53 = vand.u32 8388607, %v259_v52  ;;  %v317_v15 = vadd.s32 4294967169, %v255_v6  ;;  %vm304_vm12 = vcmp.eq.f32.partialorder %v531_v48, 2139095040 }
  0x32   :  { %v332_v56 = vand.u32 8388607, %v330_v54  ;;  %v388_v20 = vadd.s32 4294967169, %v326_v10 }
  0x33   :  { %v262_v55 = vor.u32 1065353216, %v261_v53  ;;  %v266_v25 = vadd.s32 1, %v317_v15 }
  0x34   :  { %v333_v58 = vor.u32 1065353216, %v332_v56  ;;  %v337_v30 = vadd.s32 1, %v388_v20 }
  0x35   :  { %vm263_vm0 = vcmp.ge.f32.partialorder %v262_v55, 1.4142135  ;;  %v264_v57 = vmul.f32 0.5, %v262_v55 }
  0x36   :  { %vm334_vm1 = vcmp.ge.f32.partialorder %v333_v58, 1.4142135  ;;  %v335_v60 = vmul.f32 0.5, %v333_v58  ;;  %v267_v35 = vsel %vm263_vm0, %v266_v25, %v317_v15 }
  0x37   :  { %v265_v59 = vsel %vm263_vm0, %v264_v57, %v262_v55  ;;  %v338_v39 = vsel %vm334_vm1, %v337_v30, %v388_v20  ;;  %v287_v44 = vcvt.s32.f32 %v267_v35  ;;  %vm301_vm0 = vcmp.eq.f32.partialorder %v526_v46, 1065353216 }
  0x38   :  { %v318_v61 = vadd.f32 -1.0, %v265_v59  ;;  %v336_v63 = vsel %vm334_vm1, %v335_v60, %v333_v58  ;;  %v358_v52 = vcvt.s32.f32 %v338_v39  ;;  %vm375_vm1 = vcmp.eq.f32.partialorder %v534_v49, 2139095040 }
  0x39   :  { %v389_v1 = vadd.f32 -1.0, %v336_v63 }
  0x3a   :  { %v269_v0 = vmul.f32 %v318_v61, %v318_v61 }
  0x3b   :  { %v340_v5 = vmul.f32 %v389_v1, %v389_v1 }
  0x3c   :  { %v270_v3 = vmul.f32 0.12621109, %v269_v0  ;;  %v272_v4 = vmul.f32 -0.20706727, %v269_v0 }
  0x3d   :  { %v341_v9 = vmul.f32 0.12621109, %v340_v5  ;;  %v343_v11 = vmul.f32 -0.20706727, %v340_v5 }
  0x3e   :  { %v271_v7 = vadd.f32 0.21545328, %v270_v3  ;;  %v273_v8 = vadd.f32 -0.23896284, %v272_v4 }
  0x3f   :  { %v342_v14 = vadd.f32 0.21545328, %v341_v9  ;;  %v344_v16 = vadd.f32 -0.23896284, %v343_v11 }
  0x40   :  { %v274_v12 = vmul.f32 %v271_v7, %v269_v0  ;;  %v276_v13 = vmul.f32 %v273_v8, %v269_v0 }
  0x41   :  { %v345_v19 = vmul.f32 %v342_v14, %v340_v5  ;;  %v347_v21 = vmul.f32 %v344_v16, %v340_v5 }
  0x42   :  { %v275_v17 = vadd.f32 0.28795174, %v274_v12  ;;  %v277_v18 = vadd.f32 -0.3607037, %v276_v13 }
  0x43   :  { %v346_v24 = vadd.f32 0.28795174, %v345_v19  ;;  %v348_v26 = vadd.f32 -0.3607037, %v347_v21 }
  0x44   :  { %v278_v22 = vmul.f32 %v275_v17, %v269_v0  ;;  %v280_v23 = vmul.f32 %v277_v18, %v269_v0 }
  0x45   :  { %v349_v29 = vmul.f32 %v346_v24, %v340_v5  ;;  %v351_v31 = vmul.f32 %v348_v26, %v340_v5 }
  0x46   :  { %v279_v27 = vadd.f32 0.48090908, %v278_v22  ;;  %v281_v28 = vadd.f32 -0.72134733, %v280_v23 }
  0x47   :  { %v350_v34 = vadd.f32 0.48090908, %v349_v29  ;;  %v352_v36 = vadd.f32 -0.72134733, %v351_v31 }
  0x48   :  { %v282_v32 = vmul.f32 %v279_v27, %v269_v0  ;;  %v284_v33 = vmul.f32 %v318_v61, %v281_v28 }
  0x49   :  { %v353_v38 = vmul.f32 %v350_v34, %v340_v5  ;;  %v355_v40 = vmul.f32 %v389_v1, %v352_v36 }
  0x4a   :  { %v283_v37 = vadd.f32 1.442695, %v282_v32 }
  0x4b   :  { %v354_v45 = vadd.f32 1.442695, %v353_v38 }
  0x4c   :  { %v285_v42 = vadd.f32 %v284_v33, %v283_v37 }
  0x4d   :  { %v356_v51 = vadd.f32 %v355_v40, %v354_v45 }
  0x4e   :  { %v286_v50 = vmul.f32 %v318_v61, %v285_v42 }
  0x4f   :  { %v357_v54 = vmul.f32 %v389_v1, %v356_v51 }
  0x50   :  { %v288_v53 = vadd.f32 %v287_v44, %v286_v50 }
  0x51   :  { %v359_v56 = vadd.f32 %v358_v52, %v357_v54 }
  0x52   :  { %v293_v55 = vsel %vm292_vm2, %v531_v48, %v288_v53  ;;  %vm383_vm2 = vcmp.ne.f32.partialorder %v528_v47, %v528_v47 }
  0x53   :  { %v294_v57 = vsel %vm291_vm3, nan, %v293_v55  ;;  %v364_v59 = vsel %vm363_vm5, %v534_v49, %v359_v56  ;;  %vm372_vm3 = vcmp.eq.f32.partialorder %v528_v47, 1065353216 }
  0x54   :  { %v295_v58 = vsel %vm290_vm4, -inf, %v294_v57  ;;  %v365_v61 = vsel %vm362_vm7, nan, %v364_v59 }
  0x55   :  { %v296_v60 = vsel %vm289_vm6, 0.0, %v295_v58  ;;  %v366_v63 = vsel %vm361_vm8, -inf, %v365_v61 }
  0x56   :  { %v297_v62 = vmul.f32 0.01, %v296_v60  ;;  %v367_v0 = vsel %vm360_vm9, 0.0, %v366_v63 }
  0x57   :  { %v368_v1 = vmul.f32 0.01, %v367_v0 }
  0x58   :  { %408 = vpow2.f32 %v297_v62 }
  0x59   :  { %410 = vpow2.f32 %v368_v1 }
  0x5e   :  { %v409_v2 = vpop.eup %408 }
  0x5f   :  { %v305_v3 = vsel %vm299_vm10, 2143289344, %v409_v2  ;;  %v411_v4 = vpop.eup %410 }
  0x60   :  { %v306_v5 = vsel %vm300_vm11, 0, %v305_v3  ;;  %v376_v7 = vsel %vm370_vm13, 2143289344, %v411_v4 }
  0x61   :  { %v311_v6 = vsel %vm304_vm12, 2139095040, %v306_v5  ;;  %v377_v8 = vsel %vm371_vm15, 0, %v376_v7 }
  0x62   :  { %v315_v48 = vsel %vm312_vm14, 2143289344, %v311_v6  ;;  %v382_v10 = vsel %vm375_vm1, 2139095040, %v377_v8 }
  0x63   :  { %v316_v9 = vsel %vm301_vm0, 1065353216, %v315_v48  ;;  %v386_v11 = vsel %vm383_vm2, 2143289344, %v382_v10 }
  0x64   :  { %v135_v12 = vmul.f32 %v316_v9, %v522_v41  ;;  %v387_v13 = vsel %vm372_vm3, 1065353216, %v386_v11 }
  0x65   :  { %v136_v46 = vmul.f32 %v387_v13, %v524_v43 }
  0x67   :  { %v139_v49 = vadd.f32 %v136_v46, %v135_v12 }
  0x69   :  { %141 = vst [vmem:[#allocation7 + $0x10] sm:$0xff] %v139_v49 }
  0x6a   :  { %236 = dma.vmem_to_hbm [thread:$0]  %s229_s1, 384, %s231_s23, [#allocation4], %s491_s17, %s491_s17, %s492_s18  }
  0x6b   :  { %488 = dma.done.wait [#allocation4], 384  }
  0x6c   :  { %489 = vsyncadd [#allocation4], 4294966912 }
  0x6d   :  { %241 = vsyncpa [#allocation3], 1 }
  0x6e   :  { %242 = vsyncpa [#allocation6], 1 }
  0x6f   :  { %243 = vsyncpa [#allocation4], 1 }

</bundles_post_ra>
